<compile_context>
chip_gen: v7x
topology: tpu7x:2x2x1
jax: 0.10.0
libtpu: 0.0.40
codegen_flags: <defaults>
</compile_context>

<pallas_src>
import functools
import math

import jax
import jax.numpy as jnp
from jax.experimental import pallas as pl
from jax.experimental.pallas import tpu as pltpu


def _round_up(n, m):
    return ((n + m - 1) // m) * m


# ----------------------------- phi: GIN kernel -----------------------------

def _gin_kernel(xf_ref, xr_ref, a_ref, m_ref, w1_ref, w2_ref, bn_ref, *rest, first):
    """One grid step = TN output-node rows; all 2K eigenvector channels fused on lanes.

    xf: (N, C*Din) full activations (aggregation RHS), xr: (TN, C*Din) rows,
    a:  (TN, N) adjacency rows, m: (TN, C*H) mask broadcast over features,
    w1: (C*Din, C*H) / w2: (C*H, C*H) block-diagonal (kron) shared MLP weights,
    bn: (4, C*H) rows = [bn1_scale, bn1_bias, bn2_scale, bn2_bias] tiled per channel.
    """
    if first:
        (o_ref,) = rest
    else:
        prev_ref, o_ref = rest

    # MaskedGINConv aggregation (eps=0): x_i + sum_j A[i, j] x_j, all channels at once.
    agg = xr_ref[...] + jnp.dot(a_ref[...], xf_ref[...],
                                preferred_element_type=jnp.float32)        # (TN, C*Din)

    bn = bn_ref[...]
    m = m_ref[...]

    # conv MLP: Linear(no bias) -> mask -> MaskedBN(eval) -> ReLU   (mask folded, m in {0,1})
    h = jnp.dot(agg, w1_ref[...], preferred_element_type=jnp.float32)      # (TN, C*H)
    h = jnp.maximum((h * bn[0:1, :] + bn[1:2, :]) * m, 0.0)
    # conv MLP second Linear(no bias)
    h = jnp.dot(h, w2_ref[...], preferred_element_type=jnp.float32)
    # GNN3d body: mask -> MaskedBN(eval) -> ReLU -> residual add
    h = jnp.maximum((h * bn[2:3, :] + bn[3:4, :]) * m, 0.0)
    if not first:
        h = h + prev_ref[...]
    o_ref[...] = h


def gin_layer(x_flat, adj, m_flat, lp, prev, tn):
    np_, cdin = x_flat.shape
    ch = lp["w2"].shape[1]
    full = lambda s: pl.BlockSpec(s, lambda i, _s=s: tuple(0 for _ in _s))
    rows = lambda s: pl.BlockSpec(s, lambda i, _s=s: (i,) + (0,) * (len(_s) - 1))

    in_specs = [full((np_, cdin)),            # full activations (invariant block)
                rows((tn, cdin)),             # this tile's rows (self term)
                rows((tn, np_)),              # adjacency rows
                rows((tn, ch)),               # mask
                full((cdin, ch)), full((ch, ch)), full((4, ch))]
    ops = [x_flat, x_flat, adj, m_flat, lp["w1"], lp["w2"], lp["bn"]]
    if prev is not None:
        in_specs.append(rows((tn, ch)))
        ops.append(prev)

    return pl.pallas_call(
        functools.partial(_gin_kernel, first=prev is None),
        out_shape=jax.ShapeDtypeStruct((np_, ch), jnp.float32),
        grid=(np_ // tn,),
        in_specs=in_specs,
        out_specs=rows((tn, ch)),
        compiler_params=pltpu.CompilerParams(dimension_semantics=("parallel",)),
    )(*ops)


# ------------------------- rho: SetTransformer kernel -------------------------

def _rho_kernel(x_ref, mq_ref, mk_ref, wqkv_ref, bqkv_ref, wo_ref,
                wf1_ref, bf1_ref, wf2_ref, vec6_ref, *rest, n_head, final):
    """One grid step = TN nodes; 4-head self-attention over each node's K slots."""
    if final:
        pw_ref, pbn_ref, o_ref = rest
    else:
        (o_ref,) = rest

    tn, kp, d = x_ref.shape
    dh = d // n_head
    scale = 1.0 / math.sqrt(dh)

    x2 = x_ref[...].reshape(tn * kp, d)                 # leading-dim merge (K % 8 == 0)
    mq = mq_ref[...]                                    # (TN*K, 1) query-side re-zero mask
    mk = mk_ref[...]                                    # (TN, 1, K) key_padding_mask (1 = valid)
    vec = vec6_ref[...]                                 # (6, D): [bo, ln1g, ln1b, bf2, ln2g, ln2b]

    # fused QKV projection: one MXU matmul for all heads and all (node, slot) rows.
    qkv = jnp.dot(x2, wqkv_ref[...], preferred_element_type=jnp.float32) + bqkv_ref[...]
    attn_bias = (1.0 - mk) * (-1e30)

    wo = wo_ref[...]
    attn = jnp.zeros((tn * kp, d), jnp.float32)
    for h in range(n_head):                             # static, tiny head loop (dh = D/4)
        q = qkv[:, h * dh:(h + 1) * dh].reshape(tn, kp, dh)
        k = qkv[:, d + h * dh:d + (h + 1) * dh].reshape(tn, kp, dh)
        v = qkv[:, 2 * d + h * dh:2 * d + (h + 1) * dh].reshape(tn, kp, dh)
        s = jnp.einsum('nqd,nkd->nqk', q, k,
                       preferred_element_type=jnp.float32) * scale        # (TN, K, K)
        s = s + attn_bias
        s = s - jnp.max(s, axis=-1, keepdims=True)
        e = jnp.exp(s)
        p = e * pl.reciprocal(jnp.sum(e, axis=-1, keepdims=True), approx=True)
        oh = jnp.einsum('nqk,nkd->nqd', p, v,
                        preferred_element_type=jnp.float32)               # (TN, K, dh)
        # accumulate each head through its rows of W_out (no concatenate).
        attn = attn + jnp.dot(oh.reshape(tn * kp, dh), wo[h * dh:(h + 1) * dh, :],
                              preferred_element_type=jnp.float32)

    # residual + LayerNorm 1
    y = x2 + attn + vec[0:1, :]
    mu = jnp.mean(y, axis=-1, keepdims=True)
    var = jnp.mean((y - mu) ** 2, axis=-1, keepdims=True)
    y = (y - mu) * jax.lax.rsqrt(var + 1e-5) * vec[1:2, :] + vec[2:3, :]

    # feed-forward + residual + LayerNorm 2
    ff = jnp.maximum(jnp.dot(y, wf1_ref[...], preferred_element_type=jnp.float32)
                     + bf1_ref[...], 0.0)
    ff = jnp.dot(ff, wf2_ref[...], preferred_element_type=jnp.float32) + vec[3:4, :]
    z = y + ff
    mu2 = jnp.mean(z, axis=-1, keepdims=True)
    var2 = jnp.mean((z - mu2) ** 2, axis=-1, keepdims=True)
    z = (z - mu2) * jax.lax.rsqrt(var2 + 1e-5) * vec[4:5, :] + vec[5:6, :]

    # SetTransformer invariant: padded eigenvector slots stay exactly 0.
    z = z * mq

    if final:
        # fused epilogue: sum over K slots, Linear(no bias), BatchNorm1d(eval).
        pooled = jnp.sum(z.reshape(tn, kp, d), axis=1)                    # (TN, D)
        yout = jnp.dot(pooled, pw_ref[...], preferred_element_type=jnp.float32)
        pbn = pbn_ref[...]
        o_ref[...] = yout * pbn[0:1, :] + pbn[1:2, :]
    else:
        o_ref[...] = z.reshape(tn, kp, d)


def rho_layer(x, mask_q, mask_k, p, pool, n_head, tn):
    np_, kp, d = x.shape
    f = p["wf1"].shape[1]
    full = lambda s: pl.BlockSpec(s, lambda i, _s=s: tuple(0 for _ in _s))
    rows = lambda s: pl.BlockSpec(s, lambda i, _s=s: (i,) + (0,) * (len(_s) - 1))

    in_specs = [rows((tn, kp, d)), rows((tn * kp, 1)), rows((tn, 1, kp)),
                full((d, 3 * d)), full((1, 3 * d)), full((d, d)),
                full((d, f)), full((1, f)), full((f, d)), full((6, d))]
    ops = [x, mask_q, mask_k, p["wqkv"], p["bqkv"], p["wo"],
           p["wf1"], p["bf1"], p["wf2"], p["vec6"]]
    if pool is None:
        out_shape = jax.ShapeDtypeStruct((np_, kp, d), jnp.float32)
        out_spec = rows((tn, kp, d))
    else:
        in_specs += [full((d, d)), full((2, d))]
        ops += [pool["w"], pool["bn"]]
        out_shape = jax.ShapeDtypeStruct((np_, d), jnp.float32)
        out_spec = rows((tn, d))

    return pl.pallas_call(
        functools.partial(_rho_kernel, n_head=n_head, final=pool is not None),
        out_shape=out_shape,
        grid=(np_ // tn,),
        in_specs=in_specs,
        out_specs=out_spec,
        compiler_params=pltpu.CompilerParams(dimension_semantics=("parallel",)),
    )(*ops)


# ------------------------- parameters & packing -------------------------

def init_params(key, n_hid, nl_phi, nl_rho, ffn_mult=2):
    bn_scale = 1.0 / math.sqrt(1.0 + 1e-5)     # eval-mode BN with default running stats
    params = {"phi": [], "rho": []}
    for i in range(nl_phi):
        din = 1 if i == 0 else n_hid
        key, k1, k2 = jax.random.split(key, 3)
        params["phi"].append(dict(
            w1=0.2 * jax.random.normal(k1, (din, n_hid), jnp.float32),
            w2=0.2 * jax.random.normal(k2, (n_hid, n_hid), jnp.float32),
            bn1s=jnp.full((1, n_hid), bn_scale, jnp.float32),
            bn1b=jnp.zeros((1, n_hid), jnp.float32),
            bn2s=jnp.full((1, n_hid), bn_scale, jnp.float32),
            bn2b=jnp.zeros((1, n_hid), jnp.float32),
        ))
    F = ffn_mult * n_hid
    for _ in range(nl_rho):
        key, kq, kk, kv, ko, kf1, kf2 = jax.random.split(key, 7)
        params["rho"].append(dict(
            wq=0.2 * jax.random.normal(kq, (n_hid, n_hid), jnp.float32),
            bq=jnp.zeros((1, n_hid), jnp.float32),
            wk=0.2 * jax.random.normal(kk, (n_hid, n_hid), jnp.float32),
            bk=jnp.zeros((1, n_hid), jnp.float32),
            wv=0.2 * jax.random.normal(kv, (n_hid, n_hid), jnp.float32),
            bv=jnp.zeros((1, n_hid), jnp.float32),
            wo=0.2 * jax.random.normal(ko, (n_hid, n_hid), jnp.float32),
            bo=jnp.zeros((1, n_hid), jnp.float32),
            ln1g=jnp.ones((1, n_hid), jnp.float32),
            ln1b=jnp.zeros((1, n_hid), jnp.float32),
            wf1=0.2 * jax.random.normal(kf1, (n_hid, F), jnp.float32),
            bf1=jnp.zeros((1, F), jnp.float32),
            wf2=0.2 * jax.random.normal(kf2, (F, n_hid), jnp.float32),
            bf2=jnp.zeros((1, n_hid), jnp.float32),
            ln2g=jnp.ones((1, n_hid), jnp.float32),
            ln2b=jnp.zeros((1, n_hid), jnp.float32),
        ))
    key, kout = jax.random.split(key)
    params["out_w"] = 0.2 * jax.random.normal(kout, (n_hid, n_hid), jnp.float32)
    params["out_bn_s"] = jnp.full((1, n_hid), bn_scale, jnp.float32)
    params["out_bn_b"] = jnp.zeros((1, n_hid), jnp.float32)
    return params


def _pack_phi_layer(lp, c):
    eye = jnp.eye(c, dtype=jnp.float32)
    return dict(
        w1=jnp.kron(eye, lp["w1"]),                           # (C*Din, C*H) block-diagonal
        w2=jnp.kron(eye, lp["w2"]),                           # (C*H,  C*H)
        bn=jnp.concatenate([jnp.tile(lp["bn1s"], (1, c)), jnp.tile(lp["bn1b"], (1, c)),
                            jnp.tile(lp["bn2s"], (1, c)), jnp.tile(lp["bn2b"], (1, c))],
                           axis=0),
    )


def _pack_rho_layer(p):
    return dict(
        wqkv=jnp.concatenate([p["wq"], p["wk"], p["wv"]], axis=1),
        bqkv=jnp.concatenate([p["bq"], p["bk"], p["bv"]], axis=1),
        wo=p["wo"], wf1=p["wf1"], bf1=p["bf1"], wf2=p["wf2"],
        vec6=jnp.concatenate([p["bo"], p["ln1g"], p["ln1b"],
                              p["bf2"], p["ln2g"], p["ln2b"]], axis=0),
    )


# ------------------------- SignNet forward -------------------------

def signnet_forward(params, eigV_dense, adj, mask, n_head=4):
    """eigV_dense: (N, K) dense eigenvectors, adj: (N, N), mask: (N, K) bool."""
    N, K = eigV_dense.shape
    H = params["out_w"].shape[0]
    assert H % n_head == 0

    # pad K to a multiple of 8 (layout-preserving reshapes) and N to the row tile.
    Kp = _round_up(K, 8)
    TN = min(128, _round_up(N, 8))
    Np = _round_up(N, TN)

    eigVp = jnp.pad(eigV_dense, ((0, Np - N), (0, Kp - K)))
    adjp = jnp.pad(adj, ((0, Np - N), (0, Np - N)))
    maskf = jnp.pad(mask, ((0, Np - N), (0, Kp - K))).astype(jnp.float32)

    # phi(x) and phi(-x) fused into one pass: channels C = [+x(K), -x(K)].
    C = 2 * Kp
    x0 = jnp.concatenate([eigVp, -eigVp], axis=1) * jnp.concatenate([maskf, maskf], axis=1)
    mCH = jnp.repeat(jnp.concatenate([maskf, maskf], axis=1), H, axis=1)   # (Np, C*H)

    phi_packed = [_pack_phi_layer(lp, C) for lp in params["phi"]]
    h = gin_layer(x0, adjp, mCH, phi_packed[0], prev=None, tn=TN)          # layer 0: no residual DMA
    for lp in phi_packed[1:]:
        h = gin_layer(h, adjp, mCH, lp, prev=h, tn=TN)

    # sign-invariant features: phi(x) + phi(-x)  (channel halves summed).
    h = h.reshape(Np, 2, Kp, H)
    xr = h[:, 0] + h[:, 1]                                                 # (Np, Kp, H)

    # rho = SetTransformer (pos encoder output is discarded in the reference: pos = 0).
    mq2 = maskf.reshape(Np * Kp, 1)
    mk3 = maskf.reshape(Np, 1, Kp)
    rho_packed = [_pack_rho_layer(p) for p in params["rho"]]
    pool = dict(w=params["out_w"],
                bn=jnp.concatenate([params["out_bn_s"], params["out_bn_b"]], axis=0))
    for li, rp in enumerate(rho_packed):
        last = li == len(rho_packed) - 1
        xr = rho_layer(xr, mq2, mk3, rp, pool=pool if last else None,
                       n_head=n_head, tn=TN)
    return xr[:N]


# ------------------------- demo -------------------------

if __name__ == "__main__":
    key = jax.random.PRNGKey(0)
    n_hid, nl_phi, nl_rho = 32, 2, 2

    # two small graphs: 5 nodes and 3 nodes, ring topology, undirected
    sizes = [5, 3]
    N = sum(sizes)
    K = max(sizes)                  # max #eigenvectors per graph = max graph size

    adj = jnp.zeros((N, N), jnp.float32)
    offset = 0
    for s in sizes:
        for i in range(s):
            j = (i + 1) % s
            adj = adj.at[offset + i, offset + j].add(1.0)   # message j -> i
            adj = adj.at[offset + j, offset + i].add(1.0)
        offset += s

    node_sizes = jnp.array([s for s in sizes for _ in range(s)], jnp.int32)
    mask = jnp.arange(K)[None, :] < node_sizes[:, None]      # (N, K) bool

    key, kv = jax.random.split(key)
    eigV_dense = jax.random.normal(kv, (N, K), jnp.float32) * mask.astype(jnp.float32)

    params = init_params(key, n_hid, nl_phi, nl_rho)

    out = signnet_forward(params, eigV_dense, adj, mask)
    out = jax.block_until_ready(out)
    assert out.shape == (N, n_hid)
    print("KERNEL_OK")
</pallas_src>

<mosaic_0001>
module attributes {stable_mosaic.version = 11 : i64} {
  func.func @_gin_kernel(%arg0: i32, %arg1: memref<8x16xf32, #tpu.memory_space<vmem>>, %arg2: memref<8x16xf32, #tpu.memory_space<vmem>>, %arg3: memref<8x8xf32, #tpu.memory_space<vmem>>, %arg4: memref<8x512xf32, #tpu.memory_space<vmem>>, %arg5: memref<16x512xf32, #tpu.memory_space<vmem>>, %arg6: memref<512x512xf32, #tpu.memory_space<vmem>>, %arg7: memref<4x512xf32, #tpu.memory_space<vmem>>, %arg8: memref<8x512xf32, #tpu.memory_space<vmem>>) attributes {dimension_semantics = [#tpu.dimension_semantics<parallel>], iteration_bounds = array<i64: 1>, scalar_prefetch = 0 : i64, scratch_operands = 0 : i64, tpu.core_type = #tpu.core_type<tc>, window_params = [{pipeline_mode = #tpu.pipeline_mode<synchronous>, transform_indices = @transform_0, window_bounds = array<i64: 8, 16>}, {transform_indices = @transform_1, window_bounds = array<i64: 8, 16>}, {transform_indices = @transform_2, window_bounds = array<i64: 8, 8>}, {transform_indices = @transform_3, window_bounds = array<i64: 8, 512>}, {pipeline_mode = #tpu.pipeline_mode<synchronous>, transform_indices = @transform_4, window_bounds = array<i64: 16, 512>}, {pipeline_mode = #tpu.pipeline_mode<synchronous>, transform_indices = @transform_5, window_bounds = array<i64: 512, 512>}, {pipeline_mode = #tpu.pipeline_mode<synchronous>, transform_indices = @transform_6, window_bounds = array<i64: 4, 512>}, {transform_indices = @transform_7, window_bounds = array<i64: 8, 512>}]} {
    %c0 = arith.constant 0 : index
    %c0_0 = arith.constant 0 : index
    %0 = vector.load %arg2[%c0, %c0_0] : memref<8x16xf32, #tpu.memory_space<vmem>>, vector<8x16xf32>
    %c0_1 = arith.constant 0 : index
    %c0_2 = arith.constant 0 : index
    %1 = vector.load %arg3[%c0_1, %c0_2] : memref<8x8xf32, #tpu.memory_space<vmem>>, vector<8x8xf32>
    %c0_3 = arith.constant 0 : index
    %c0_4 = arith.constant 0 : index
    %2 = vector.load %arg1[%c0_3, %c0_4] : memref<8x16xf32, #tpu.memory_space<vmem>>, vector<8x16xf32>
    %cst = arith.constant dense<0.000000e+00> : vector<8x16xf32>
    %3 = tpu.matmul %1, %2, %cst {dimension_numbers = #tpu.dot_dimension_numbers<[1], [0], [0], [1], [0, 0, 1, 1], [], []>} : vector<8x8xf32>, vector<8x16xf32>, vector<8x16xf32> -> vector<8x16xf32>
    %4 = arith.addf %0, %3 : vector<8x16xf32>
    %c0_5 = arith.constant 0 : index
    %c0_6 = arith.constant 0 : index
    %5 = vector.load %arg7[%c0_5, %c0_6] : memref<4x512xf32, #tpu.memory_space<vmem>>, vector<4x512xf32>
    %c0_7 = arith.constant 0 : index
    %c0_8 = arith.constant 0 : index
    %6 = vector.load %arg4[%c0_7, %c0_8] : memref<8x512xf32, #tpu.memory_space<vmem>>, vector<8x512xf32>
    %c0_9 = arith.constant 0 : index
    %c0_10 = arith.constant 0 : index
    %7 = vector.load %arg5[%c0_9, %c0_10] : memref<16x512xf32, #tpu.memory_space<vmem>>, vector<16x512xf32>
    %cst_11 = arith.constant dense<0.000000e+00> : vector<8x512xf32>
    %8 = tpu.matmul %4, %7, %cst_11 {dimension_numbers = #tpu.dot_dimension_numbers<[1], [0], [0], [1], [0, 0, 1, 1], [], []>} : vector<8x16xf32>, vector<16x512xf32>, vector<8x512xf32> -> vector<8x512xf32>
    %9 = vector.extract_strided_slice %5 {offsets = [0, 0], sizes = [1, 512], strides = [1, 1]} : vector<4x512xf32> to vector<1x512xf32>
    %10 = vector.broadcast %9 : vector<1x512xf32> to vector<8x512xf32>
    %11 = arith.mulf %8, %10 : vector<8x512xf32>
    %12 = vector.extract_strided_slice %5 {offsets = [1, 0], sizes = [1, 512], strides = [1, 1]} : vector<4x512xf32> to vector<1x512xf32>
    %13 = vector.broadcast %12 : vector<1x512xf32> to vector<8x512xf32>
    %14 = arith.addf %11, %13 : vector<8x512xf32>
    %15 = arith.mulf %14, %6 : vector<8x512xf32>
    %cst_12 = arith.constant 0.000000e+00 : f32
    %16 = vector.broadcast %cst_12 : f32 to vector<8x512xf32>
    %17 = arith.maximumf %15, %16 : vector<8x512xf32>
    %c0_13 = arith.constant 0 : index
    %c0_14 = arith.constant 0 : index
    %18 = vector.load %arg6[%c0_13, %c0_14] : memref<512x512xf32, #tpu.memory_space<vmem>>, vector<512x512xf32>
    %cst_15 = arith.constant dense<0.000000e+00> : vector<8x512xf32>
    %19 = tpu.matmul %17, %18, %cst_15 {dimension_numbers = #tpu.dot_dimension_numbers<[1], [0], [0], [1], [0, 0, 1, 1], [], []>} : vector<8x512xf32>, vector<512x512xf32>, vector<8x512xf32> -> vector<8x512xf32>
    %20 = vector.extract_strided_slice %5 {offsets = [2, 0], sizes = [1, 512], strides = [1, 1]} : vector<4x512xf32> to vector<1x512xf32>
    %21 = vector.broadcast %20 : vector<1x512xf32> to vector<8x512xf32>
    %22 = arith.mulf %19, %21 : vector<8x512xf32>
    %23 = vector.extract_strided_slice %5 {offsets = [3, 0], sizes = [1, 512], strides = [1, 1]} : vector<4x512xf32> to vector<1x512xf32>
    %24 = vector.broadcast %23 : vector<1x512xf32> to vector<8x512xf32>
    %25 = arith.addf %22, %24 : vector<8x512xf32>
    %26 = arith.mulf %25, %6 : vector<8x512xf32>
    %cst_16 = arith.constant 0.000000e+00 : f32
    %27 = vector.broadcast %cst_16 : f32 to vector<8x512xf32>
    %28 = arith.maximumf %26, %27 : vector<8x512xf32>
    %c0_17 = arith.constant 0 : index
    %c0_18 = arith.constant 0 : index
    %29 = vector.load %arg8[%c0_17, %c0_18] : memref<8x512xf32, #tpu.memory_space<vmem>>, vector<8x512xf32>
    tpu.vector_store %arg8[%c0_17, %c0_18], %28 {strides = array<i32>} : memref<8x512xf32, #tpu.memory_space<vmem>>, vector<8x512xf32>,
    return
  }
  func.func @transform_0(%arg0: i32) -> (i32, i32) {
    %c0_i32 = arith.constant 0 : i32
    %c0_i32_0 = arith.constant 0 : i32
    %c0_i32_1 = arith.constant 0 : i32
    return %c0_i32, %c0_i32_0 : i32, i32
  }
  func.func @transform_1(%arg0: i32) -> (i32, i32) {
    %c0_i32 = arith.constant 0 : i32
    %c0_i32_0 = arith.constant 0 : i32
    return %arg0, %c0_i32 : i32, i32
  }
  func.func @transform_2(%arg0: i32) -> (i32, i32) {
    %c0_i32 = arith.constant 0 : i32
    %c0_i32_0 = arith.constant 0 : i32
    return %arg0, %c0_i32 : i32, i32
  }
  func.func @transform_3(%arg0: i32) -> (i32, i32) {
    %c0_i32 = arith.constant 0 : i32
    %c0_i32_0 = arith.constant 0 : i32
    return %arg0, %c0_i32 : i32, i32
  }
  func.func @transform_4(%arg0: i32) -> (i32, i32) {
    %c0_i32 = arith.constant 0 : i32
    %c0_i32_0 = arith.constant 0 : i32
    %c0_i32_1 = arith.constant 0 : i32
    return %c0_i32, %c0_i32_0 : i32, i32
  }
  func.func @transform_5(%arg0: i32) -> (i32, i32) {
    %c0_i32 = arith.constant 0 : i32
    %c0_i32_0 = arith.constant 0 : i32
    %c0_i32_1 = arith.constant 0 : i32
    return %c0_i32, %c0_i32_0 : i32, i32
  }
  func.func @transform_6(%arg0: i32) -> (i32, i32) {
    %c0_i32 = arith.constant 0 : i32
    %c0_i32_0 = arith.constant 0 : i32
    %c0_i32_1 = arith.constant 0 : i32
    return %c0_i32, %c0_i32_0 : i32, i32
  }
  func.func @transform_7(%arg0: i32) -> (i32, i32) {
    %c0_i32 = arith.constant 0 : i32
    %c0_i32_0 = arith.constant 0 : i32
    return %arg0, %c0_i32 : i32, i32
  }
}

</mosaic_0001>

<bundles_post_ra>
// kernel: tpu_custom_call.1
= control target key start
LH: loop header
LB: loop body
LE: loop exit
PB: predicated region body
PF: predicated region fallthrough
CT: control target
= control target key end

     0   :  { %12 = vsyncpa [#allocation3], 0  ;;  %s1720_s0 = inlined_call_operand.hbm [shape: f32[8,16], index: 0, kind: input, shape index: {}]   ;;  %s1721_s1 = inlined_call_operand.hbm [shape: f32[8,16], index: 1, kind: input, shape index: {}]   ;;  %s1722_s2 = inlined_call_operand.hbm [shape: f32[8,8], index: 2, kind: input, shape index: {}]   ;;  %s1723_s3 = inlined_call_operand.hbm [shape: f32[8,512], index: 3, kind: input, shape index: {}]   ;;  %s1724_s4 = inlined_call_operand.hbm [shape: f32[16,512], index: 4, kind: input, shape index: {}]   ;;  %s1725_s5 = inlined_call_operand.hbm [shape: f32[512,512], index: 5, kind: input, shape index: {}]   ;;  %s1726_s6 = inlined_call_operand.vmem [shape: f32[4,512], index: 6, kind: input, shape index: {}]   ;;  %s1727_s7 = inlined_call_operand.hbm [shape: f32[8,512], index: 7, kind: output, shape index: {}]  }
   0x1   :  { %13 = vsyncpa [#allocation6], 0 }
   0x2   :  { %14 = vsyncpa [#allocation9], 0 }
   0x3   :  { %15 = vsyncpa [#allocation12], 0 }
   0x4   :  { %16 = vsyncpa [#allocation4], 0  ;;  %s1532_s24 = smov [#allocation5]   ;;  %s1533_s26 = smov [#allocation8]  }
   0x5   :  { %s33_s25 = sshll.u32 %s1532_s24, 4  ;;  %s53_s27 = sshll.u32 %s1533_s26, 4  ;;  %s34_s25 = int_to_ptr.vmem [resolvable:$true] %s33_s25  ;;  %s54_s27 = int_to_ptr.vmem [resolvable:$true] %s53_s27 }
   0x6   :  { %s1368_s30 = scalar_lea.hbm %s1721_s1, 128 }
   0x7   :  { %p1369_p0 = scmp.ne.s32.totalorder %s1721_s1, %s1368_s30  ;;  %p1372_p1 = scmp.lt.u32.totalorder %s1368_s30, %s1721_s1 }
   0x9   :  { %p1374_p2 = pnand %p1372_p1, %p1369_p0 }
   0xb   :  { %1377 = shalt.err (!%p1374_p2)
}
   0xc   :  { %s1378_s12 = scalar_lea.vmem %s34_s25, 128  ;;  %p1383_p4 = scmp.lt.s32.totalorder %s34_s25, %s34_s25 }
   0xd   :  { %p1379_p3 = scmp.ne.s32.totalorder %s34_s25, %s1378_s12  ;;  %p1384_p5 = scmp.lt.s32.totalorder %s1378_s12, %s1378_s12 }
   0xf   :  { %p1385_p6 = por %p1384_p5, %p1383_p4 }
  0x11   :  { %p1386_p7 = pnand %p1385_p6, %p1379_p3 }
  0x13   :  { %1389 = shalt.err (!%p1386_p7)
}
  0x14   :  { %36 = dma.hbm_to_vmem [thread:$0]  %s1721_s1, 128, %s34_s25, [#allocation6]  }
  0x15   :  { %s1390_s17 = scalar_lea.hbm %s1723_s3, 512 }
  0x16   :  { %p1391_p8 = scmp.ne.s32.totalorder %s1723_s3, %s1390_s17  ;;  %p1394_p9 = scmp.lt.u32.totalorder %s1390_s17, %s1723_s3 }
  0x18   :  { %p1396_p10 = pnand %p1394_p9, %p1391_p8 }
  0x1a   :  { %1399 = shalt.err (!%p1396_p10)
}
  0x1b   :  { %s1400_s22 = scalar_lea.vmem %s54_s27, 512  ;;  %p1405_p12 = scmp.lt.s32.totalorder %s54_s27, %s54_s27 }
  0x1c   :  { %p1401_p11 = scmp.ne.s32.totalorder %s54_s27, %s1400_s22  ;;  %p1406_p13 = scmp.lt.s32.totalorder %s1400_s22, %s1400_s22 }
  0x1e   :  { %p1407_p0 = por %p1406_p13, %p1405_p12 }
  0x20   :  { %p1408_p1 = pnand %p1407_p0, %p1401_p11 }
  0x22   :  { %1411 = shalt.err (!%p1408_p1)
}
  0x23   :  { %56 = dma.hbm_to_vmem [thread:$0]  %s1723_s3, 512, %s54_s27, [#allocation9]  }
  0x24   :  { %s1534_s24 = smov [#allocation2]   ;;  %s1535_s26 = smov [#allocation7]  }
  0x25   :  { %s23_s25 = sshll.u32 %s1534_s24, 4  ;;  %s43_s28 = sshll.u32 %s1535_s26, 4  ;;  %s24_s25 = int_to_ptr.vmem [resolvable:$true] %s23_s25  ;;  %s44_s28 = int_to_ptr.vmem [resolvable:$true] %s43_s28 }
  0x26   :  { %s1412_s8 = scalar_lea.hbm %s1720_s0, 128 }
  0x27   :  { %p1413_p2 = scmp.ne.s32.totalorder %s1720_s0, %s1412_s8  ;;  %p1416_p3 = scmp.lt.u32.totalorder %s1412_s8, %s1720_s0 }
  0x29   :  { %p1418_p4 = pnand %p1416_p3, %p1413_p2 }
  0x2b   :  { %1421 = shalt.err (!%p1418_p4)
}
  0x2c   :  { %s1422_s3 = scalar_lea.vmem %s24_s25, 128  ;;  %p1427_p6 = scmp.lt.s32.totalorder %s24_s25, %s24_s25 }
  0x2d   :  { %p1423_p5 = scmp.ne.s32.totalorder %s24_s25, %s1422_s3  ;;  %p1428_p7 = scmp.lt.s32.totalorder %s1422_s3, %s1422_s3 }
  0x2f   :  { %p1429_p8 = por %p1428_p7, %p1427_p6 }
  0x31   :  { %p1430_p9 = pnand %p1429_p8, %p1423_p5 }
  0x33   :  { %1433 = shalt.err (!%p1430_p9)
}
  0x34   :  { %26 = dma.hbm_to_vmem [thread:$0]  %s1720_s0, 128, %s24_s25, [#allocation3]  }
  0x35   :  { %s1434_s16 = scalar_lea.hbm %s1722_s2, 128 }
  0x36   :  { %p1435_p10 = scmp.ne.s32.totalorder %s1722_s2, %s1434_s16  ;;  %p1438_p11 = scmp.lt.u32.totalorder %s1434_s16, %s1722_s2 }
  0x38   :  { %p1440_p12 = pnand %p1438_p11, %p1435_p10 }
  0x3a   :  { %1443 = shalt.err (!%p1440_p12)
}
  0x3b   :  { %s1444_s21 = scalar_lea.vmem %s44_s28, 128  ;;  %p1449_p0 = scmp.lt.s32.totalorder %s44_s28, %s44_s28 }
  0x3c   :  { %p1445_p13 = scmp.ne.s32.totalorder %s44_s28, %s1444_s21  ;;  %p1450_p1 = scmp.lt.s32.totalorder %s1444_s21, %s1444_s21 }
  0x3e   :  { %p1451_p2 = por %p1450_p1, %p1449_p0 }
  0x40   :  { %p1452_p3 = pnand %p1451_p2, %p1445_p13 }
  0x42   :  { %1455 = shalt.err (!%p1452_p3)
}
  0x43   :  { %46 = dma.hbm_to_vmem [thread:$0]  %s1722_s2, 128, %s44_s28, [#allocation6]  }
  0x44   :  { %s1536_s1 = smov [#allocation10]   ;;  %s1456_s26 = scalar_lea.hbm %s1724_s4, 1024 }
  0x45   :  { %s62_s23 = sshll.u32 %s1536_s1, 4  ;;  %p1457_p4 = scmp.ne.s32.totalorder %s1724_s4, %s1456_s26  ;;  %s63_s23 = int_to_ptr.vmem [resolvable:$true] %s62_s23 }
  0x46   :  { %p1460_p5 = scmp.lt.u32.totalorder %s1456_s26, %s1724_s4 }
  0x48   :  { %p1462_p6 = pnand %p1460_p5, %p1457_p4 }
  0x4a   :  { %1465 = shalt.err (!%p1462_p6)
}
  0x4b   :  { %s1466_s10 = scalar_lea.vmem %s63_s23, 1024  ;;  %p1471_p8 = scmp.lt.s32.totalorder %s63_s23, %s63_s23 }
  0x4c   :  { %p1467_p7 = scmp.ne.s32.totalorder %s63_s23, %s1466_s10  ;;  %p1472_p9 = scmp.lt.s32.totalorder %s1466_s10, %s1466_s10 }
  0x4e   :  { %p1473_p10 = por %p1472_p9, %p1471_p8 }
  0x50   :  { %p1474_p11 = pnand %p1473_p10, %p1467_p7 }
  0x52   :  { %1477 = shalt.err (!%p1474_p11)
}
  0x53   :  { %s1537_s2 = smov 512   ;;  %s1538_s28 = smov 32  }
  0x54   :  { %68 = dma.hbm_to_vmem [thread:$0]  %s1724_s4, 1024, %s63_s23, [#allocation9], %s1537_s2, %s1537_s2, %s1538_s28  }
  0x55   :  { %s1539_s3 = smov [#allocation11]   ;;  %s1478_s15 = scalar_lea.hbm %s1725_s5, 32768 }
  0x56   :  { %s74_s27 = sshll.u32 %s1539_s3, 4  ;;  %p1479_p12 = scmp.ne.s32.totalorder %s1725_s5, %s1478_s15  ;;  %s75_s27 = int_to_ptr.vmem [resolvable:$true] %s74_s27 }
  0x57   :  { %p1482_p13 = scmp.lt.u32.totalorder %s1478_s15, %s1725_s5 }
  0x59   :  { %p1484_p0 = pnand %p1482_p13, %p1479_p12 }
  0x5b   :  { %1487 = shalt.err (!%p1484_p0)
}
  0x5c   :  { %s1488_s20 = scalar_lea.vmem %s75_s27, 32768  ;;  %p1493_p2 = scmp.lt.s32.totalorder %s75_s27, %s75_s27 }
  0x5d   :  { %p1489_p1 = scmp.ne.s32.totalorder %s75_s27, %s1488_s20  ;;  %p1494_p3 = scmp.lt.s32.totalorder %s1488_s20, %s1488_s20 }
  0x5f   :  { %p1495_p4 = por %p1494_p3, %p1493_p2 }
  0x61   :  { %p1496_p5 = pnand %p1495_p4, %p1489_p1 }
  0x63   :  { %1499 = shalt.err (!%p1496_p5)
}
  0x64   :  { %80 = dma.hbm_to_vmem [thread:$0]  %s1725_s5, 32768, %s75_s27, [#allocation12], %s1537_s2, %s1537_s2, %s1538_s28  }
  0x65   :  { %1522 = dma.done.wait [#allocation3], 128  }
  0x66   :  { %1523 = vsyncadd [#allocation3], 4294967168 }
  0x67   :  { %1524 = dma.done.wait [#allocation6], 256  }
  0x68   :  { %1525 = vsyncadd [#allocation6], 4294967040 }
  0x69   :  { %1526 = dma.done.wait [#allocation9], 1536  }
  0x6a   :  { %1527 = vsyncadd [#allocation9], 4294965760 }
  0x6b   :  { %1528 = dma.done.wait [#allocation12], 32768  }
  0x6c   :  { %1529 = vsyncadd [#allocation12], 4294934528  ;;  %v1540_v0 = vmov 0.0   ;;  %vm1541_vm0 = vmmov 0   ;;  %vm104_vm1 = vcmask 64512   ;;  %v103_v1 = vld [vmem:[#allocation2] sm:$0xff] }
  0x6d   :  { %1084 = vmatprep.subr.mxu0 %v1540_v0  ;;  %1086 = vmatprep.mubr.msk.f32.mxu0 %vm1541_vm0, %v1540_v0  ;;  %v102_v2 = vld [vmem:[#allocation7] sm:$0xff]  ;;  %v186_v3 = vld [vmem:[#allocation10 + $0x8] sm:$0xff]  ;;  %v185_v9 = vld [vmem:[#allocation10] sm:$0xff]  ;;  %vm193_vm2 = vcmask 130048  }
  0x6e   :  { %261 = vmatprep.mubr.f32.mxu1 %v1540_v0  ;;  %1085 = vmatpush3.msra.mxu0 %v103_v1  ;;  %v190_v4 = vld [vmem:[#allocation10 + $0x28] sm:$0xff]  ;;  %v188_v5 = vld [vmem:[#allocation10 + $0x18] sm:$0xff]  ;;  %v189_v10 = vld [vmem:[#allocation10 + $0x20] sm:$0xff] }
  0x6f   :  { %v192_v6 = vld [vmem:[#allocation10 + $0x38] sm:$0xff]  ;;  %1087 = vmatmul.mubr.msk.f32.vlgmr.msra.gmra.mrb[0].mxu0 %vm104_vm1, %v102_v2  ;;  %v1089_v7 = vpack.c.bf16 %v190_v4, %v186_v3  ;;  %v187_v11 = vld [vmem:[#allocation10 + $0x10] sm:$0xff]  ;;  %v1091_v12 = vpack.c.bf16 %v189_v10, %v185_v9  ;;  %v430_v15 = vld [vmem:[#allocation11 + $0x8] sm:$0xff] }
  0x70   :  { %v1093_v8 = vpack.c.bf16 %v192_v6, %v188_v5  ;;  %332 = vmatprep.mubr.f32.mxu0 %v1540_v0  ;;  %v191_v13 = vld [vmem:[#allocation10 + $0x30] sm:$0xff]  ;;  %v434_v16 = vld [vmem:[#allocation11 + $0x28] sm:$0xff]  ;;  %v432_v17 = vld [vmem:[#allocation11 + $0x18] sm:$0xff] }
  0x71   :  { %1090 = vmatprep.subr.bf16.mxu1 %v1089_v7  ;;  %v1095_v14 = vpack.c.bf16 %v191_v13, %v187_v11  ;;  %v1097_v18 = vpack.c.bf16 %v434_v16, %v430_v15  ;;  %v436_v19 = vld [vmem:[#allocation11 + $0x38] sm:$0xff]  ;;  %v101_v21 = vld [vmem:[#allocation5] sm:$0xff]  ;;  %v429_v22 = vld [vmem:[#allocation11] sm:$0xff] }
  0x72   :  { %1094 = vmatprep.subr.bf16.mxu0 %v1093_v8  ;;  %1092 = vmatpush1.bf16.msra.mxu1 %v1091_v12  ;;  %v1225_v20 = vpack.c.bf16 %v436_v19, %v432_v17  ;;  %v433_v23 = vld [vmem:[#allocation11 + $0x20] sm:$0xff]  ;;  %v431_v24 = vld [vmem:[#allocation11 + $0x10] sm:$0xff]  ;;  %v438_v26 = vld [vmem:[#allocation11 + $0x48] sm:$0xff] }
  0x73   :  { %1096 = vmatpush1.bf16.msra.mxu0 %v1095_v14  ;;  %1098 = vmatprep.subr.bf16.mxu1 %v1097_v18  ;;  %v435_v25 = vld [vmem:[#allocation11 + $0x30] sm:$0xff]  ;;  %v442_v27 = vld [vmem:[#allocation11 + $0x68] sm:$0xff]  ;;  %v440_v28 = vld [vmem:[#allocation11 + $0x58] sm:$0xff]  ;;  %v1099_v31 = vpack.c.bf16 %v433_v23, %v429_v22 }
  0x74   :  { %1226 = vmatprep.subr.bf16.mxu0 %v1225_v20  ;;  %v444_v29 = vld [vmem:[#allocation11 + $0x78] sm:$0xff]  ;;  %v1227_v32 = vpack.c.bf16 %v435_v25, %v431_v24  ;;  %v437_v33 = vld [vmem:[#allocation11 + $0x40] sm:$0xff]  ;;  %v1101_v37 = vpack.c.bf16 %v442_v27, %v438_v26  ;;  %v439_v39 = vld [vmem:[#allocation11 + $0x50] sm:$0xff] }
  0x75   :  { %v441_v34 = vld [vmem:[#allocation11 + $0x60] sm:$0xff]  ;;  %v1229_v38 = vpack.c.bf16 %v444_v29, %v440_v28  ;;  %v443_v40 = vld [vmem:[#allocation11 + $0x70] sm:$0xff]  ;;  %v446_v41 = vld [vmem:[#allocation11 + $0x88] sm:$0xff] }
  0x76   :  { %v450_v42 = vld [vmem:[#allocation11 + $0xa8] sm:$0xff]  ;;  %v448_v43 = vld [vmem:[#allocation11 + $0x98] sm:$0xff]  ;;  %v1103_v45 = vpack.c.bf16 %v441_v34, %v437_v33  ;;  %v1231_v46 = vpack.c.bf16 %v443_v40, %v439_v39  ;;  %v445_v47 = vld [vmem:[#allocation11 + $0x80] sm:$0xff] }
  0x77   :  { %v452_v44 = vld [vmem:[#allocation11 + $0xb8] sm:$0xff]  ;;  %v449_v48 = vld [vmem:[#allocation11 + $0xa0] sm:$0xff]  ;;  %v1105_v49 = vpack.c.bf16 %v450_v42, %v446_v41  ;;  %v447_v51 = vld [vmem:[#allocation11 + $0x90] sm:$0xff] }
  0x78   :  { %v1233_v50 = vpack.c.bf16 %v452_v44, %v448_v43  ;;  %v451_v52 = vld [vmem:[#allocation11 + $0xb0] sm:$0xff]  ;;  %v454_v53 = vld [vmem:[#allocation11 + $0xc8] sm:$0xff]  ;;  %v456_v55 = vld [vmem:[#allocation11 + $0xd8] sm:$0xff]  ;;  %v1107_v57 = vpack.c.bf16 %v449_v48, %v445_v47 }
  0x79   :  { %v458_v54 = vld [vmem:[#allocation11 + $0xe8] sm:$0xff]  ;;  %v460_v56 = vld [vmem:[#allocation11 + $0xf8] sm:$0xff]  ;;  %v1235_v58 = vpack.c.bf16 %v451_v52, %v447_v51  ;;  %v453_v59 = vld [vmem:[#allocation11 + $0xc0] sm:$0xff] }
  0x7a   :  { %v457_v60 = vld [vmem:[#allocation11 + $0xe0] sm:$0xff]  ;;  %v1109_v61 = vpack.c.bf16 %v458_v54, %v454_v53  ;;  %v1237_v62 = vpack.c.bf16 %v460_v56, %v456_v55  ;;  %v455_v63 = vld [vmem:[#allocation11 + $0xd0] sm:$0xff]  ;;  %v462_v1 = vld [vmem:[#allocation11 + $0x108] sm:$0xff] }
  0x7b   :  { %v459_v0 = vld [vmem:[#allocation11 + $0xf0] sm:$0xff]  ;;  %v466_v2 = vld [vmem:[#allocation11 + $0x128] sm:$0xff]  ;;  %v464_v3 = vld [vmem:[#allocation11 + $0x118] sm:$0xff]  ;;  %v1111_v5 = vpack.c.bf16 %v457_v60, %v453_v59 }
  0x7c   :  { %v468_v4 = vld [vmem:[#allocation11 + $0x138] sm:$0xff]  ;;  %v1239_v6 = vpack.c.bf16 %v459_v0, %v455_v63  ;;  %v461_v7 = vld [vmem:[#allocation11 + $0x100] sm:$0xff]  ;;  %v1113_v9 = vpack.c.bf16 %v466_v2, %v462_v1  ;;  %v463_v11 = vld [vmem:[#allocation11 + $0x110] sm:$0xff] }
  0x7d   :  { %v465_v8 = vld [vmem:[#allocation11 + $0x120] sm:$0xff]  ;;  %v1241_v10 = vpack.c.bf16 %v468_v4, %v464_v3  ;;  %v467_v12 = vld [vmem:[#allocation11 + $0x130] sm:$0xff]  ;;  %v470_v13 = vld [vmem:[#allocation11 + $0x148] sm:$0xff] }
  0x7e   :  { %v474_v14 = vld [vmem:[#allocation11 + $0x168] sm:$0xff]  ;;  %v472_v15 = vld [vmem:[#allocation11 + $0x158] sm:$0xff]  ;;  %v1115_v17 = vpack.c.bf16 %v465_v8, %v461_v7  ;;  %v1243_v18 = vpack.c.bf16 %v467_v12, %v463_v11  ;;  %v469_v19 = vld [vmem:[#allocation11 + $0x140] sm:$0xff] }
  0x7f   :  { %v476_v16 = vld [vmem:[#allocation11 + $0x178] sm:$0xff]  ;;  %v473_v20 = vld [vmem:[#allocation11 + $0x160] sm:$0xff]  ;;  %v471_v23 = vld [vmem:[#allocation11 + $0x150] sm:$0xff] }
  0x80   :  { %v1245_v22 = vpack.c.bf16 %v476_v16, %v472_v15  ;;  %v475_v24 = vld [vmem:[#allocation11 + $0x170] sm:$0xff]  ;;  %v478_v25 = vld [vmem:[#allocation11 + $0x188] sm:$0xff]  ;;  %v480_v27 = vld [vmem:[#allocation11 + $0x198] sm:$0xff]  ;;  %v1119_v29 = vpack.c.bf16 %v473_v20, %v469_v19 }
  0x81   :  { %v482_v26 = vld [vmem:[#allocation11 + $0x1a8] sm:$0xff]  ;;  %v484_v28 = vld [vmem:[#allocation11 + $0x1b8] sm:$0xff]  ;;  %v485_v43 = vld [vmem:[#allocation11 + $0x1c0] sm:$0xff] }
  0x82   :  { %v1121_v33 = vpack.c.bf16 %v482_v26, %v478_v25  ;;  %v1249_v34 = vpack.c.bf16 %v484_v28, %v480_v27  ;;  %v488_v39 = vld [vmem:[#allocation11 + $0x1d8] sm:$0xff]  ;;  %v489_v44 = vld [vmem:[#allocation11 + $0x1e0] sm:$0xff]  ;;  %v487_v47 = vld [vmem:[#allocation11 + $0x1d0] sm:$0xff] }
  0x83   :  { %v492_v40 = vld [vmem:[#allocation11 + $0x1f8] sm:$0xff]  ;;  %v491_v48 = vld [vmem:[#allocation11 + $0x1f0] sm:$0xff]  ;;  %v1127_v53 = vpack.c.bf16 %v489_v44, %v485_v43  ;;  %v493_v55 = vld [vmem:[#allocation11 + $0x200] sm:$0xff] }
  0x84   :  { %v496_v51 = vld [vmem:[#allocation11 + $0x218] sm:$0xff]  ;;  %v1255_v54 = vpack.c.bf16 %v491_v48, %v487_v47  ;;  %v497_v56 = vld [vmem:[#allocation11 + $0x220] sm:$0xff]  ;;  %v495_v59 = vld [vmem:[#allocation11 + $0x210] sm:$0xff] }
  0x85   :  { %v500_v52 = vld [vmem:[#allocation11 + $0x238] sm:$0xff]  ;;  %v499_v60 = vld [vmem:[#allocation11 + $0x230] sm:$0xff]  ;;  %v1131_v1 = vpack.c.bf16 %v497_v56, %v493_v55  ;;  %v501_v3 = vld [vmem:[#allocation11 + $0x240] sm:$0xff] }
  0x86   :  { %v504_v63 = vld [vmem:[#allocation11 + $0x258] sm:$0xff]  ;;  %v1259_v2 = vpack.c.bf16 %v499_v60, %v495_v59  ;;  %v505_v4 = vld [vmem:[#allocation11 + $0x260] sm:$0xff]  ;;  %v503_v7 = vld [vmem:[#allocation11 + $0x250] sm:$0xff] }
  0x87   :  { %v508_v0 = vld [vmem:[#allocation11 + $0x278] sm:$0xff]  ;;  %v507_v8 = vld [vmem:[#allocation11 + $0x270] sm:$0xff]  ;;  %v509_v15 = vld [vmem:[#allocation11 + $0x280] sm:$0xff] }
  0x88   :  { %v512_v11 = vld [vmem:[#allocation11 + $0x298] sm:$0xff]  ;;  %v513_v16 = vld [vmem:[#allocation11 + $0x2a0] sm:$0xff]  ;;  %v511_v19 = vld [vmem:[#allocation11 + $0x290] sm:$0xff] }
  0x89   :  { %v516_v12 = vld [vmem:[#allocation11 + $0x2b8] sm:$0xff]  ;;  %v515_v20 = vld [vmem:[#allocation11 + $0x2b0] sm:$0xff]  ;;  %v1139_v25 = vpack.c.bf16 %v513_v16, %v509_v15  ;;  %v517_v27 = vld [vmem:[#allocation11 + $0x2c0] sm:$0xff] }
  0x8a   :  { %v1267_v26 = vpack.c.bf16 %v515_v20, %v511_v19  ;;  %v521_v28 = vld [vmem:[#allocation11 + $0x2e0] sm:$0xff]  ;;  %v527_v43 = vld [vmem:[#allocation11 + $0x310] sm:$0xff]  ;;  %v536_v47 = vld [vmem:[#allocation11 + $0x358] sm:$0xff] }
  0x8b   :  { %v531_v44 = vld [vmem:[#allocation11 + $0x330] sm:$0xff]  ;;  %v540_v48 = vld [vmem:[#allocation11 + $0x378] sm:$0xff]  ;;  %v542_v59 = vld [vmem:[#allocation11 + $0x388] sm:$0xff] }
  0x8c   :  { %v535_v55 = vld [vmem:[#allocation11 + $0x350] sm:$0xff]  ;;  %v546_v60 = vld [vmem:[#allocation11 + $0x3a8] sm:$0xff] }
  0x8d   :  { %v539_v56 = vld [vmem:[#allocation11 + $0x370] sm:$0xff]  ;;  %v558_v19 = vld [vmem:[#allocation11 + $0x408] sm:$0xff] }
  0x8e   :  { %v551_v15 = vld [vmem:[#allocation11 + $0x3d0] sm:$0xff]  ;;  %v562_v20 = vld [vmem:[#allocation11 + $0x428] sm:$0xff] }
  0x8f   :  { %v555_v16 = vld [vmem:[#allocation11 + $0x3f0] sm:$0xff] }
 0x142   :  { %v174_v30 = vpop.f32.mrb[0].mxu0 }
 0x143   :  { %v178_v35 = vadd.f32 %v174_v30, %v101_v21  ;;  %v1088_v36 = vpop.f32.mrb[1].mxu0  ;;  %v1117_v21 = vpack.c.bf16 %v474_v14, %v470_v13  ;;  %v1247_v30 = vpack.c.bf16 %v475_v24, %v471_v23  ;;  %v1135_v13 = vpack.c.bf16 %v505_v4, %v501_v3  ;;  %v520_v23 = vld [vmem:[#allocation11 + $0x2d8] sm:$0xff]  ;;  %v543_v3 = vld [vmem:[#allocation11 + $0x390] sm:$0xff] }
 0x144   :  { %v483_v36 = vld [vmem:[#allocation11 + $0x1b0] sm:$0xff]  ;;  %v1263_v14 = vpack.c.bf16 %v507_v8, %v503_v7  ;;  %v524_v24 = vld [vmem:[#allocation11 + $0x2f8] sm:$0xff]  ;;  %v550_v7 = vld [vmem:[#allocation11 + $0x3c8] sm:$0xff] }
 0x145   :  { %1080 = vmatmul.mubr.msk.f32.vlgmr.msra.gmra.mrb[0].mxu1 %vm193_vm2, %v178_v35  ;;  %1081 = vmatmul.mubr.msk.f32.vlgmr.msra.gmra.mrb[2].mxu0 %vm193_vm2, %v178_v35  ;;  %v479_v35 = vld [vmem:[#allocation11 + $0x190] sm:$0xff]  ;;  %v554_v8 = vld [vmem:[#allocation11 + $0x3e8] sm:$0xff] }
 0x146   :  { %1100 = vmatpush1.bf16.msra.mxu1 %v1099_v31  ;;  %1228 = vmatpush1.bf16.msra.mxu0 %v1227_v32  ;;  %v477_v31 = vld [vmem:[#allocation11 + $0x180] sm:$0xff]  ;;  %v1251_v42 = vpack.c.bf16 %v483_v36, %v479_v35  ;;  %v528_v35 = vld [vmem:[#allocation11 + $0x318] sm:$0xff]  ;;  %v547_v4 = vld [vmem:[#allocation11 + $0x3b0] sm:$0xff] }
 0x147   :  { %1102 = vmatprep.subr.bf16.mxu1 %v1101_v37  ;;  %1230 = vmatprep.subr.bf16.mxu0 %v1229_v38  ;;  %v481_v32 = vld [vmem:[#allocation11 + $0x1a0] sm:$0xff]  ;;  %v486_v37 = vld [vmem:[#allocation11 + $0x1c8] sm:$0xff]  ;;  %v532_v36 = vld [vmem:[#allocation11 + $0x338] sm:$0xff] }
 0x148   :  { %v490_v38 = vld [vmem:[#allocation11 + $0x1e8] sm:$0xff]  ;;  %v1123_v41 = vpack.c.bf16 %v481_v32, %v477_v31  ;;  %v519_v31 = vld [vmem:[#allocation11 + $0x2d0] sm:$0xff] }
 0x149   :  { %v523_v32 = vld [vmem:[#allocation11 + $0x2f0] sm:$0xff] }
 0x14a   :  { %1104 = vmatpush1.bf16.msra.mxu1 %v1103_v45  ;;  %1232 = vmatpush1.bf16.msra.mxu0 %v1231_v46  ;;  %v1125_v45 = vpack.c.bf16 %v490_v38, %v486_v37  ;;  %v1253_v46 = vpack.c.bf16 %v492_v40, %v488_v39  ;;  %v1143_v37 = vpack.c.bf16 %v521_v28, %v517_v27  ;;  %v525_v39 = vld [vmem:[#allocation11 + $0x300] sm:$0xff]  ;;  %v1663_v28 = vld [vmem:[%s1726_s6] sm:$0xff] }
 0x14b   :  { %1106 = vmatprep.subr.bf16.mxu1 %v1105_v49  ;;  %1234 = vmatprep.subr.bf16.mxu0 %v1233_v50  ;;  %v494_v49 = vld [vmem:[#allocation11 + $0x208] sm:$0xff]  ;;  %v1271_v38 = vpack.c.bf16 %v523_v32, %v519_v31  ;;  %v529_v40 = vld [vmem:[#allocation11 + $0x320] sm:$0xff] }
 0x14c   :  { %v498_v50 = vld [vmem:[#allocation11 + $0x228] sm:$0xff] }
 0x14e   :  { %1108 = vmatpush1.bf16.msra.mxu1 %v1107_v57  ;;  %1236 = vmatpush1.bf16.msra.mxu0 %v1235_v58  ;;  %v1129_v57 = vpack.c.bf16 %v498_v50, %v494_v49  ;;  %v1257_v58 = vpack.c.bf16 %v500_v52, %v496_v51  ;;  %v1147_v49 = vpack.c.bf16 %v529_v40, %v525_v39  ;;  %v533_v51 = vld [vmem:[#allocation11 + $0x340] sm:$0xff] }
 0x14f   :  { %1110 = vmatprep.subr.bf16.mxu1 %v1109_v61  ;;  %1238 = vmatprep.subr.bf16.mxu0 %v1237_v62  ;;  %v502_v61 = vld [vmem:[#allocation11 + $0x248] sm:$0xff]  ;;  %v1275_v50 = vpack.c.bf16 %v531_v44, %v527_v43 }
 0x150   :  { %v506_v62 = vld [vmem:[#allocation11 + $0x268] sm:$0xff] }
 0x152   :  { %1112 = vmatpush1.bf16.msra.mxu1 %v1111_v5  ;;  %1240 = vmatpush1.bf16.msra.mxu0 %v1239_v6  ;;  %v1133_v5 = vpack.c.bf16 %v506_v62, %v502_v61  ;;  %v1261_v6 = vpack.c.bf16 %v508_v0, %v504_v63  ;;  %v544_v61 = vld [vmem:[#allocation11 + $0x398] sm:$0xff]  ;;  %v541_v63 = vld [vmem:[#allocation11 + $0x380] sm:$0xff] }
 0x153   :  { %1114 = vmatprep.subr.bf16.mxu1 %v1113_v9  ;;  %1242 = vmatprep.subr.bf16.mxu0 %v1241_v10  ;;  %v510_v9 = vld [vmem:[#allocation11 + $0x288] sm:$0xff]  ;;  %v548_v62 = vld [vmem:[#allocation11 + $0x3b8] sm:$0xff]  ;;  %v545_v0 = vld [vmem:[#allocation11 + $0x3a0] sm:$0xff] }
 0x154   :  { %v514_v10 = vld [vmem:[#allocation11 + $0x2a8] sm:$0xff] }
 0x156   :  { %1116 = vmatpush1.bf16.msra.mxu1 %v1115_v17  ;;  %1244 = vmatpush1.bf16.msra.mxu0 %v1243_v18  ;;  %v1137_v17 = vpack.c.bf16 %v514_v10, %v510_v9  ;;  %v1265_v18 = vpack.c.bf16 %v516_v12, %v512_v11  ;;  %v552_v9 = vld [vmem:[#allocation11 + $0x3d8] sm:$0xff]  ;;  %v1157_v10 = vpack.c.bf16 %v554_v8, %v550_v7  ;;  %v549_v12 = vld [vmem:[#allocation11 + $0x3c0] sm:$0xff]  ;;  %v570_v8 = vld [vmem:[#allocation11 + $0x468] sm:$0xff] }
 0x157   :  { %1118 = vmatprep.subr.bf16.mxu1 %v1117_v21  ;;  %1246 = vmatprep.subr.bf16.mxu0 %v1245_v22  ;;  %v518_v21 = vld [vmem:[#allocation11 + $0x2c8] sm:$0xff]  ;;  %v556_v11 = vld [vmem:[#allocation11 + $0x3f8] sm:$0xff] }
 0x158   :  { %v522_v22 = vld [vmem:[#allocation11 + $0x2e8] sm:$0xff] }
 0x15a   :  { %1120 = vmatpush1.bf16.msra.mxu1 %v1119_v29  ;;  %1248 = vmatpush1.bf16.msra.mxu0 %v1247_v30  ;;  %v1141_v29 = vpack.c.bf16 %v522_v22, %v518_v21  ;;  %v1269_v30 = vpack.c.bf16 %v524_v24, %v520_v23  ;;  %v560_v21 = vld [vmem:[#allocation11 + $0x418] sm:$0xff]  ;;  %v1161_v22 = vpack.c.bf16 %v562_v20, %v558_v19  ;;  %v574_v19 = vld [vmem:[#allocation11 + $0x488] sm:$0xff] }
 0x15b   :  { %1122 = vmatprep.subr.bf16.mxu1 %v1121_v33  ;;  %1250 = vmatprep.subr.bf16.mxu0 %v1249_v34  ;;  %v526_v33 = vld [vmem:[#allocation11 + $0x308] sm:$0xff]  ;;  %v564_v23 = vld [vmem:[#allocation11 + $0x438] sm:$0xff] }
 0x15c   :  { %v530_v34 = vld [vmem:[#allocation11 + $0x328] sm:$0xff]  ;;  %v1289_v24 = vpack.c.bf16 %v564_v23, %v560_v21  ;;  %v576_v23 = vld [vmem:[#allocation11 + $0x498] sm:$0xff] }
 0x15e   :  { %1124 = vmatpush1.bf16.msra.mxu1 %v1123_v41  ;;  %1252 = vmatpush1.bf16.msra.mxu0 %v1251_v42  ;;  %v1145_v41 = vpack.c.bf16 %v530_v34, %v526_v33  ;;  %v1273_v42 = vpack.c.bf16 %v532_v36, %v528_v35 }
 0x15f   :  { %1126 = vmatprep.subr.bf16.mxu1 %v1125_v45  ;;  %1254 = vmatprep.subr.bf16.mxu0 %v1253_v46  ;;  %v534_v45 = vld [vmem:[#allocation11 + $0x348] sm:$0xff] }
 0x160   :  { %v538_v46 = vld [vmem:[#allocation11 + $0x368] sm:$0xff] }
 0x161   :  { %v1149_v52 = vpack.c.bf16 %v538_v46, %v534_v45 }
 0x162   :  { %1128 = vmatpush1.bf16.msra.mxu1 %v1127_v53  ;;  %1256 = vmatpush1.bf16.msra.mxu0 %v1255_v54  ;;  %v1277_v53 = vpack.c.bf16 %v540_v48, %v536_v47  ;;  %v537_v54 = vld [vmem:[#allocation11 + $0x360] sm:$0xff] }
 0x163   :  { %1130 = vmatprep.subr.bf16.mxu1 %v1129_v57  ;;  %1258 = vmatprep.subr.bf16.mxu0 %v1257_v58  ;;  %v1151_v57 = vpack.c.bf16 %v537_v54, %v533_v51  ;;  %v1279_v58 = vpack.c.bf16 %v539_v56, %v535_v55  ;;  %v1681_v55 = vld [vmem:[#allocation8] sm:$0xff] }
 0x166   :  { %1132 = vmatpush1.bf16.msra.mxu1 %v1131_v1  ;;  %1260 = vmatpush1.bf16.msra.mxu0 %v1259_v2  ;;  %v1153_v1 = vpack.c.bf16 %v546_v60, %v542_v59  ;;  %v1281_v2 = vpack.c.bf16 %v548_v62, %v544_v61  ;;  %v1685_v60 = vld [vmem:[#allocation8 + $0x8] sm:$0xff] }
 0x167   :  { %1134 = vmatprep.subr.bf16.mxu1 %v1133_v5  ;;  %1262 = vmatprep.subr.bf16.mxu0 %v1261_v6  ;;  %v1155_v5 = vpack.c.bf16 %v545_v0, %v541_v63  ;;  %v1283_v6 = vpack.c.bf16 %v547_v4, %v543_v3  ;;  %v557_v63 = vld [vmem:[#allocation11 + $0x400] sm:$0xff]  ;;  %v1687_v0 = vld [vmem:[#allocation8 + $0x18] sm:$0xff]  ;;  %v559_v3 = vld [vmem:[#allocation11 + $0x410] sm:$0xff] }
 0x168   :  { %v563_v4 = vld [vmem:[#allocation11 + $0x430] sm:$0xff] }
 0x16a   :  { %1136 = vmatpush1.bf16.msra.mxu1 %v1135_v13  ;;  %1264 = vmatpush1.bf16.msra.mxu0 %v1263_v14  ;;  %v1285_v13 = vpack.c.bf16 %v556_v11, %v552_v9  ;;  %v553_v14 = vld [vmem:[#allocation11 + $0x3e0] sm:$0xff]  ;;  %v568_v9 = vld [vmem:[#allocation11 + $0x458] sm:$0xff] }
 0x16b   :  { %1138 = vmatprep.subr.bf16.mxu1 %v1137_v17  ;;  %1266 = vmatprep.subr.bf16.mxu0 %v1265_v18  ;;  %v1159_v17 = vpack.c.bf16 %v553_v14, %v549_v12  ;;  %v1287_v18 = vpack.c.bf16 %v555_v16, %v551_v15  ;;  %v565_v14 = vld [vmem:[#allocation11 + $0x440] sm:$0xff] }
 0x16c   :  { %v569_v15 = vld [vmem:[#allocation11 + $0x460] sm:$0xff] }
 0x16e   :  { %1140 = vmatpush1.bf16.msra.mxu1 %v1139_v25  ;;  %1268 = vmatpush1.bf16.msra.mxu0 %v1267_v26  ;;  %v341_v25 = vlaneseq }
 0x16f   :  { %1142 = vmatprep.subr.bf16.mxu1 %v1141_v29  ;;  %1270 = vmatprep.subr.bf16.mxu0 %v1269_v30  ;;  %v1668_v29 = vld [vmem:[%s1726_s6 + $0x8] sm:$0xff]  ;;  %s1542_s6 = smov [#allocation13]  }
 0x170   :  { %v1657_v26 = vshrl.u32 %v341_v25, 7  ;;  %s1067_s23 = sshll.u32 %s1542_s6, 4  ;;  %s1068_s23 = int_to_ptr.vmem [resolvable:$true] %s1067_s23 }
 0x171   :  { %s1500_s24 = scalar_lea.vmem %s1068_s23, 512  ;;  %p1505_p7 = scmp.lt.s32.totalorder %s1068_s23, %s1068_s23 }
 0x172   :  { %1144 = vmatpush1.bf16.msra.mxu1 %v1143_v37  ;;  %1272 = vmatpush1.bf16.msra.mxu0 %v1271_v38  ;;  %v343_v27 = vsub.s32 0, %v1657_v26  ;;  %v347_v30 = vsub.s32 4, %v1657_v26  ;;  %v383_v31 = vsub.s32 1, %v1657_v26  ;;  %v387_v32 = vsub.s32 5, %v1657_v26  ;;  %p1501_p6 = scmp.ne.s32.totalorder %s1068_s23, %s1500_s24  ;;  %p1506_p8 = scmp.lt.s32.totalorder %s1500_s24, %s1500_s24 }
 0x173   :  { %1146 = vmatprep.subr.bf16.mxu1 %v1145_v41  ;;  %1274 = vmatprep.subr.bf16.mxu0 %v1273_v42 }
 0x174   :  { %v344_v33 = vrot.slane %v1663_v28, %v343_v27  ;;  %v352_v34 = vrot.slane %v1668_v29, %v343_v27  ;;  %v348_v35 = vrot.slane %v1663_v28, %v347_v30  ;;  %v356_v36 = vrot.slane %v1668_v29, %v347_v30  ;;  %p1507_p9 = por %p1506_p8, %p1505_p7 }
 0x175   :  { %v384_v37 = vrot.slane %v1663_v28, %v383_v31  ;;  %v392_v38 = vrot.slane %v1668_v29, %v383_v31  ;;  %v388_v39 = vrot.slane %v1663_v28, %v387_v32  ;;  %v396_v40 = vrot.slane %v1668_v29, %v387_v32  ;;  %v577_v32 = vld [vmem:[#allocation11 + $0x4a0] sm:$0xff] }
 0x176   :  { %1148 = vmatpush1.bf16.msra.mxu1 %v1147_v49  ;;  %1276 = vmatpush1.bf16.msra.mxu0 %v1275_v50  ;;  %v364_v41 = vrot.slane %v344_v33, %v343_v27  ;;  %v372_v42 = vrot.slane %v352_v34, %v343_v27  ;;  %v368_v43 = vrot.slane %v348_v35, %v343_v27  ;;  %v575_v35 = vld [vmem:[#allocation11 + $0x490] sm:$0xff]  ;;  %p1508_p10 = pnand %p1507_p9, %p1501_p6 }
 0x177   :  { %1150 = vmatprep.subr.bf16.mxu1 %v1149_v52  ;;  %1278 = vmatprep.subr.bf16.mxu0 %v1277_v53  ;;  %v376_v44 = vrot.slane %v356_v36, %v343_v27  ;;  %v404_v45 = vrot.slane %v384_v37, %v383_v31  ;;  %v412_v46 = vrot.slane %v392_v38, %v383_v31  ;;  %v579_v36 = vld [vmem:[#allocation11 + $0x4b0] sm:$0xff]  ;;  %v582_v37 = vld [vmem:[#allocation11 + $0x4c8] sm:$0xff] }
 0x178   :  { %v408_v49 = vrot.slane %v388_v39, %v383_v31  ;;  %v416_v50 = vrot.slane %v396_v40, %v383_v31  ;;  %v1167_v27 = vpack.c.bf16 %v569_v15, %v565_v14  ;;  %v573_v31 = vld [vmem:[#allocation11 + $0x480] sm:$0xff]  ;;  %v586_v38 = vld [vmem:[#allocation11 + $0x4e8] sm:$0xff]  ;;  %v584_v39 = vld [vmem:[#allocation11 + $0x4d8] sm:$0xff] }
 0x179   :  { %v588_v40 = vld [vmem:[#allocation11 + $0x4f8] sm:$0xff]  ;;  %v610_v14 = vld [vmem:[#allocation11 + $0x5a8] sm:$0xff] }
 0x17a   :  { %1152 = vmatpush1.bf16.msra.mxu1 %v1151_v57  ;;  %1280 = vmatpush1.bf16.msra.mxu0 %v1279_v58  ;;  %v608_v15 = vld [vmem:[#allocation11 + $0x598] sm:$0xff] }
 0x17b   :  { %1154 = vmatprep.subr.bf16.mxu1 %v1153_v1  ;;  %1282 = vmatprep.subr.bf16.mxu0 %v1281_v2  ;;  %v561_v2 = vld [vmem:[#allocation11 + $0x420] sm:$0xff] }
 0x17c   :  { %v1163_v12 = vpack.c.bf16 %v561_v2, %v557_v63  ;;  %v595_v63 = vld [vmem:[#allocation11 + $0x530] sm:$0xff]  ;;  %v602_v2 = vld [vmem:[#allocation11 + $0x568] sm:$0xff] }
 0x17e   :  { %1156 = vmatpush1.bf16.msra.mxu1 %v1155_v5  ;;  %1284 = vmatpush1.bf16.msra.mxu0 %v1283_v6  ;;  %v566_v6 = vld [vmem:[#allocation11 + $0x448] sm:$0xff] }
 0x17f   :  { %1158 = vmatprep.subr.bf16.mxu1 %v1157_v10  ;;  %1286 = vmatprep.subr.bf16.mxu0 %v1285_v13  ;;  %v572_v10 = vld [vmem:[#allocation11 + $0x478] sm:$0xff]  ;;  %v1291_v13 = vpack.c.bf16 %v563_v4, %v559_v3  ;;  %v1165_v20 = vpack.c.bf16 %v570_v8, %v566_v6  ;;  %v601_v8 = vld [vmem:[#allocation11 + $0x560] sm:$0xff] }
 0x180   :  { %v1293_v21 = vpack.c.bf16 %v572_v10, %v568_v9  ;;  %v600_v3 = vld [vmem:[#allocation11 + $0x558] sm:$0xff] }
 0x181   :  { %v604_v4 = vld [vmem:[#allocation11 + $0x578] sm:$0xff] }
 0x182   :  { %1160 = vmatpush1.bf16.msra.mxu1 %v1159_v17  ;;  %1288 = vmatpush1.bf16.msra.mxu0 %v1287_v18  ;;  %v567_v17 = vld [vmem:[#allocation11 + $0x450] sm:$0xff]  ;;  %v1309_v10 = vpack.c.bf16 %v604_v4, %v600_v3  ;;  %v638_v4 = vld [vmem:[#allocation11 + $0x688] sm:$0xff] }
 0x183   :  { %1162 = vmatprep.subr.bf16.mxu1 %v1161_v22  ;;  %1290 = vmatprep.subr.bf16.mxu0 %v1289_v24  ;;  %v571_v18 = vld [vmem:[#allocation11 + $0x470] sm:$0xff]  ;;  %v578_v22 = vld [vmem:[#allocation11 + $0x4a8] sm:$0xff]  ;;  %v580_v24 = vld [vmem:[#allocation11 + $0x4b8] sm:$0xff] }
 0x184   :  { %v1295_v30 = vpack.c.bf16 %v571_v18, %v567_v17  ;;  %v1169_v33 = vpack.c.bf16 %v578_v22, %v574_v19  ;;  %v1297_v34 = vpack.c.bf16 %v580_v24, %v576_v23  ;;  %v605_v19 = vld [vmem:[#allocation11 + $0x580] sm:$0xff]  ;;  %v607_v23 = vld [vmem:[#allocation11 + $0x590] sm:$0xff] }
 0x185   :  { %v611_v24 = vld [vmem:[#allocation11 + $0x5b0] sm:$0xff] }
 0x186   :  { %v635_v3 = vld [vmem:[#allocation11 + $0x670] sm:$0xff] }
 0x218   :  { %v263_v47 = vpop.f32.mrb[0].mxu1  ;;  %v334_v48 = vpop.f32.mrb[2].mxu0 }
 0x219   :  { %v377_v51 = vmul.f32 %v364_v41, %v263_v47  ;;  %v379_v52 = vmul.f32 %v372_v42, %v334_v48  ;;  %v265_v53 = vpop.f32.mrb[1].mxu1  ;;  %v336_v54 = vpop.f32.mrb[3].mxu0  ;;  %v1171_v41 = vpack.c.bf16 %v577_v32, %v573_v31  ;;  %v1299_v42 = vpack.c.bf16 %v579_v36, %v575_v35  ;;  %v583_v47 = vld [vmem:[#allocation11 + $0x4d0] sm:$0xff]  ;;  %v620_v31 = vld [vmem:[#allocation11 + $0x5f8] sm:$0xff]  ;;  %v617_v35 = vld [vmem:[#allocation11 + $0x5e0] sm:$0xff] }
 0x21a   :  { %v378_v56 = vmul.f32 %v368_v43, %v265_v53  ;;  %v380_v57 = vmul.f32 %v376_v44, %v336_v54  ;;  %v581_v43 = vld [vmem:[#allocation11 + $0x4c0] sm:$0xff]  ;;  %v587_v48 = vld [vmem:[#allocation11 + $0x4f0] sm:$0xff] }
 0x21b   :  { %v417_v58 = vadd.f32 %v404_v45, %v377_v51  ;;  %v1683_v59 = vadd.f32 %v412_v46, %v379_v52  ;;  %v585_v44 = vld [vmem:[#allocation11 + $0x4e0] sm:$0xff]  ;;  %v1173_v45 = vpack.c.bf16 %v586_v38, %v582_v37  ;;  %v1301_v46 = vpack.c.bf16 %v588_v40, %v584_v39  ;;  %v592_v51 = vld [vmem:[#allocation11 + $0x518] sm:$0xff]  ;;  %v615_v38 = vld [vmem:[#allocation11 + $0x5d0] sm:$0xff] }
 0x21c   :  { %v418_v61 = vadd.f32 %v408_v49, %v378_v56  ;;  %v420_v62 = vadd.f32 %v416_v50, %v380_v57  ;;  %v590_v49 = vld [vmem:[#allocation11 + $0x508] sm:$0xff]  ;;  %v596_v52 = vld [vmem:[#allocation11 + $0x538] sm:$0xff]  ;;  %v1175_v53 = vpack.c.bf16 %v585_v44, %v581_v43  ;;  %v1303_v54 = vpack.c.bf16 %v587_v48, %v583_v47  ;;  %v589_v56 = vld [vmem:[#allocation11 + $0x500] sm:$0xff] }
 0x21d   :  { %v421_v1 = vmul.f32 %v417_v58, %v1681_v55  ;;  %v594_v50 = vld [vmem:[#allocation11 + $0x528] sm:$0xff]  ;;  %v593_v57 = vld [vmem:[#allocation11 + $0x520] sm:$0xff]  ;;  %v619_v39 = vld [vmem:[#allocation11 + $0x5f0] sm:$0xff] }
 0x21e   :  { %v422_v5 = vmul.f32 %v418_v61, %v1685_v60  ;;  %v424_v7 = vmul.f32 %v420_v62, %v1687_v0  ;;  %v1177_v58 = vpack.c.bf16 %v594_v50, %v590_v49  ;;  %v1305_v61 = vpack.c.bf16 %v596_v52, %v592_v51  ;;  %v591_v62 = vld [vmem:[#allocation11 + $0x510] sm:$0xff]  ;;  %v622_v40 = vld [vmem:[#allocation11 + $0x608] sm:$0xff]  ;;  %v628_v43 = vld [vmem:[#allocation11 + $0x638] sm:$0xff] }
 0x21f   :  { %v425_v16 = vmax.f32 %v421_v1, 0.0  ;;  %v598_v1 = vld [vmem:[#allocation11 + $0x548] sm:$0xff]  ;;  %v1307_v6 = vpack.c.bf16 %v595_v63, %v591_v62  ;;  %v625_v47 = vld [vmem:[#allocation11 + $0x620] sm:$0xff]  ;;  %v623_v50 = vld [vmem:[#allocation11 + $0x610] sm:$0xff] }
 0x220   :  { %v426_v11 = vmax.f32 %v422_v5, 0.0  ;;  %v428_v25 = vmax.f32 %v424_v7, 0.0  ;;  %v1179_v5 = vpack.c.bf16 %v593_v57, %v589_v56  ;;  %v597_v7 = vld [vmem:[#allocation11 + $0x540] sm:$0xff]  ;;  %v1181_v9 = vpack.c.bf16 %v602_v2, %v598_v1  ;;  %v627_v51 = vld [vmem:[#allocation11 + $0x630] sm:$0xff]  ;;  %v630_v52 = vld [vmem:[#allocation11 + $0x648] sm:$0xff] }
 0x221   :  { %v1183_v17 = vpack.c.bf16 %v601_v8, %v597_v7  ;;  %v636_v56 = vld [vmem:[#allocation11 + $0x678] sm:$0xff]  ;;  %v633_v62 = vld [vmem:[#allocation11 + $0x660] sm:$0xff]  ;;  %v631_v2 = vld [vmem:[#allocation11 + $0x650] sm:$0xff] }
 0x222   :  { %749 = vmatprep.mubr.f32.mxu1 %v426_v11  ;;  %891 = vmatprep.mubr.f32.mxu0 %v426_v11  ;;  %v599_v11 = vld [vmem:[#allocation11 + $0x550] sm:$0xff]  ;;  %v644_v7 = vld [vmem:[#allocation11 + $0x6b8] sm:$0xff] }
 0x223   :  { %750 = vmatmul.mubr.f32.vlgmr.msra.gmra.mrb[2].mxu1 %v425_v16  ;;  %892 = vmatmul.mubr.f32.vlgmr.msra.gmra.mrb[4].mxu0 %v425_v16  ;;  %v612_v16 = vld [vmem:[#allocation11 + $0x5b8] sm:$0xff] }
 0x224   :  { %1164 = vmatpush1.bf16.msra.mxu1 %v1163_v12  ;;  %1292 = vmatpush1.bf16.msra.mxu0 %v1291_v13  ;;  %v603_v12 = vld [vmem:[#allocation11 + $0x570] sm:$0xff]  ;;  %v606_v13 = vld [vmem:[#allocation11 + $0x588] sm:$0xff]  ;;  %v1313_v22 = vpack.c.bf16 %v612_v16, %v608_v15 }
 0x225   :  { %820 = vmatprep.mubr.f32.mxu1 %v428_v25  ;;  %962 = vmatprep.mubr.f32.mxu0 %v428_v25  ;;  %v1311_v18 = vpack.c.bf16 %v603_v12, %v599_v11  ;;  %v614_v25 = vld [vmem:[#allocation11 + $0x5c8] sm:$0xff]  ;;  %v641_v11 = vld [vmem:[#allocation11 + $0x6a0] sm:$0xff]  ;;  %v643_v15 = vld [vmem:[#allocation11 + $0x6b0] sm:$0xff] }
 0x226   :  { %1166 = vmatprep.subr.bf16.mxu1 %v1165_v20  ;;  %1294 = vmatprep.subr.bf16.mxu0 %v1293_v21  ;;  %v609_v20 = vld [vmem:[#allocation11 + $0x5a0] sm:$0xff]  ;;  %v1185_v21 = vpack.c.bf16 %v610_v14, %v606_v13  ;;  %v639_v14 = vld [vmem:[#allocation11 + $0x690] sm:$0xff]  ;;  %v646_v16 = vld [vmem:[#allocation11 + $0x6c8] sm:$0xff] }
 0x227   :  { %v1187_v32 = vpack.c.bf16 %v609_v20, %v605_v19  ;;  %v652_v19 = vld [vmem:[#allocation11 + $0x6f8] sm:$0xff] }
 0x228   :  { %1168 = vmatpush1.bf16.msra.mxu1 %v1167_v27  ;;  %1296 = vmatpush1.bf16.msra.mxu0 %v1295_v30  ;;  %v618_v27 = vld [vmem:[#allocation11 + $0x5e8] sm:$0xff]  ;;  %v616_v30 = vld [vmem:[#allocation11 + $0x5d8] sm:$0xff] }
 0x229   :  { %1170 = vmatprep.subr.bf16.mxu1 %v1169_v33  ;;  %1298 = vmatprep.subr.bf16.mxu0 %v1297_v34  ;;  %v1315_v33 = vpack.c.bf16 %v611_v24, %v607_v23  ;;  %v613_v34 = vld [vmem:[#allocation11 + $0x5c0] sm:$0xff]  ;;  %v1189_v36 = vpack.c.bf16 %v618_v27, %v614_v25  ;;  %v1317_v37 = vpack.c.bf16 %v620_v31, %v616_v30  ;;  %v647_v27 = vld [vmem:[#allocation11 + $0x6d0] sm:$0xff]  ;;  %v654_v31 = vld [vmem:[#allocation11 + $0x708] sm:$0xff] }
 0x22a   :  { %v1191_v44 = vpack.c.bf16 %v617_v35, %v613_v34  ;;  %v649_v23 = vld [vmem:[#allocation11 + $0x6e0] sm:$0xff]  ;;  %v651_v30 = vld [vmem:[#allocation11 + $0x6f0] sm:$0xff]  ;;  %v660_v34 = vld [vmem:[#allocation11 + $0x738] sm:$0xff] }
 0x22c   :  { %1172 = vmatpush1.bf16.msra.mxu1 %v1171_v41  ;;  %1300 = vmatpush1.bf16.msra.mxu0 %v1299_v42  ;;  %v626_v41 = vld [vmem:[#allocation11 + $0x628] sm:$0xff]  ;;  %v624_v42 = vld [vmem:[#allocation11 + $0x618] sm:$0xff] }
 0x22d   :  { %1174 = vmatprep.subr.bf16.mxu1 %v1173_v45  ;;  %1302 = vmatprep.subr.bf16.mxu0 %v1301_v46  ;;  %v1319_v45 = vpack.c.bf16 %v619_v39, %v615_v38  ;;  %v621_v46 = vld [vmem:[#allocation11 + $0x600] sm:$0xff]  ;;  %v1193_v48 = vpack.c.bf16 %v626_v41, %v622_v40  ;;  %v1321_v49 = vpack.c.bf16 %v628_v43, %v624_v42  ;;  %v655_v41 = vld [vmem:[#allocation11 + $0x710] sm:$0xff]  ;;  %v662_v43 = vld [vmem:[#allocation11 + $0x748] sm:$0xff] }
 0x22e   :  { %v1195_v57 = vpack.c.bf16 %v625_v47, %v621_v46  ;;  %v657_v38 = vld [vmem:[#allocation11 + $0x720] sm:$0xff]  ;;  %v659_v42 = vld [vmem:[#allocation11 + $0x730] sm:$0xff]  ;;  %v668_v46 = vld [vmem:[#allocation11 + $0x778] sm:$0xff] }
 0x230   :  { %1176 = vmatpush1.bf16.msra.mxu1 %v1175_v53  ;;  %1304 = vmatpush1.bf16.msra.mxu0 %v1303_v54  ;;  %v634_v53 = vld [vmem:[#allocation11 + $0x668] sm:$0xff]  ;;  %v632_v54 = vld [vmem:[#allocation11 + $0x658] sm:$0xff] }
 0x231   :  { %1178 = vmatprep.subr.bf16.mxu1 %v1177_v58  ;;  %1306 = vmatprep.subr.bf16.mxu0 %v1305_v61  ;;  %v1323_v58 = vpack.c.bf16 %v627_v51, %v623_v50  ;;  %v629_v61 = vld [vmem:[#allocation11 + $0x640] sm:$0xff]  ;;  %v1197_v63 = vpack.c.bf16 %v634_v53, %v630_v52  ;;  %v1325_v1 = vpack.c.bf16 %v636_v56, %v632_v54  ;;  %v663_v53 = vld [vmem:[#allocation11 + $0x750] sm:$0xff]  ;;  %v670_v56 = vld [vmem:[#allocation11 + $0x788] sm:$0xff] }
 0x232   :  { %v1199_v8 = vpack.c.bf16 %v633_v62, %v629_v61  ;;  %v665_v50 = vld [vmem:[#allocation11 + $0x760] sm:$0xff]  ;;  %v667_v54 = vld [vmem:[#allocation11 + $0x770] sm:$0xff]  ;;  %v676_v61 = vld [vmem:[#allocation11 + $0x7b8] sm:$0xff] }
 0x234   :  { %1180 = vmatpush1.bf16.msra.mxu1 %v1179_v5  ;;  %1308 = vmatpush1.bf16.msra.mxu0 %v1307_v6  ;;  %v642_v5 = vld [vmem:[#allocation11 + $0x6a8] sm:$0xff]  ;;  %v640_v6 = vld [vmem:[#allocation11 + $0x698] sm:$0xff] }
 0x235   :  { %1182 = vmatprep.subr.bf16.mxu1 %v1181_v9  ;;  %1310 = vmatprep.subr.bf16.mxu0 %v1309_v10  ;;  %v1327_v9 = vpack.c.bf16 %v635_v3, %v631_v2  ;;  %v637_v10 = vld [vmem:[#allocation11 + $0x680] sm:$0xff]  ;;  %v1201_v12 = vpack.c.bf16 %v642_v5, %v638_v4  ;;  %v1329_v13 = vpack.c.bf16 %v644_v7, %v640_v6  ;;  %v671_v5 = vld [vmem:[#allocation11 + $0x790] sm:$0xff]  ;;  %v678_v7 = vld [vmem:[#allocation11 + $0x7c8] sm:$0xff] }
 0x236   :  { %v1203_v20 = vpack.c.bf16 %v641_v11, %v637_v10  ;;  %v673_v2 = vld [vmem:[#allocation11 + $0x7a0] sm:$0xff]  ;;  %v675_v6 = vld [vmem:[#allocation11 + $0x7b0] sm:$0xff]  ;;  %v684_v10 = vld [vmem:[#allocation11 + $0x7f8] sm:$0xff] }
 0x238   :  { %1184 = vmatpush1.bf16.msra.mxu1 %v1183_v17  ;;  %1312 = vmatpush1.bf16.msra.mxu0 %v1311_v18  ;;  %v650_v17 = vld [vmem:[#allocation11 + $0x6e8] sm:$0xff]  ;;  %v648_v18 = vld [vmem:[#allocation11 + $0x6d8] sm:$0xff] }
 0x239   :  { %1186 = vmatprep.subr.bf16.mxu1 %v1185_v21  ;;  %1314 = vmatprep.subr.bf16.mxu0 %v1313_v22  ;;  %v1331_v21 = vpack.c.bf16 %v643_v15, %v639_v14  ;;  %v645_v22 = vld [vmem:[#allocation11 + $0x6c0] sm:$0xff]  ;;  %v1205_v24 = vpack.c.bf16 %v650_v17, %v646_v16  ;;  %v1333_v25 = vpack.c.bf16 %v652_v19, %v648_v18  ;;  %v679_v17 = vld [vmem:[#allocation11 + $0x7d0] sm:$0xff] }
 0x23a   :  { %v1207_v35 = vpack.c.bf16 %v649_v23, %v645_v22  ;;  %v681_v16 = vld [vmem:[#allocation11 + $0x7e0] sm:$0xff]  ;;  %v683_v18 = vld [vmem:[#allocation11 + $0x7f0] sm:$0xff] }
 0x23b   :  { %v183_v19 = vld [vmem:[#allocation8 + $0x10] sm:$0xff] }
 0x23c   :  { %1188 = vmatpush1.bf16.msra.mxu1 %v1187_v32  ;;  %1316 = vmatpush1.bf16.msra.mxu0 %v1315_v33  ;;  %v658_v32 = vld [vmem:[#allocation11 + $0x728] sm:$0xff]  ;;  %v656_v33 = vld [vmem:[#allocation11 + $0x718] sm:$0xff]  ;;  %v423_v22 = vmul.f32 %v1683_v59, %v183_v19 }
 0x23d   :  { %1190 = vmatprep.subr.bf16.mxu1 %v1189_v36  ;;  %1318 = vmatprep.subr.bf16.mxu0 %v1317_v37  ;;  %v1335_v36 = vpack.c.bf16 %v651_v30, %v647_v27  ;;  %v653_v37 = vld [vmem:[#allocation11 + $0x700] sm:$0xff]  ;;  %v1209_v39 = vpack.c.bf16 %v658_v32, %v654_v31  ;;  %v1337_v40 = vpack.c.bf16 %v660_v34, %v656_v33  ;;  %v1011_v27 = vsub.s32 3, %v1657_v26 }
 0x23e   :  { %v1211_v47 = vpack.c.bf16 %v657_v38, %v653_v37  ;;  %v427_v23 = vmax.f32 %v423_v22, 0.0  ;;  %v1015_v30 = vsub.s32 7, %v1657_v26 }
 0x23f   :  { %v1012_v34 = vrot.slane %v1663_v28, %v1011_v27 }
 0x240   :  { %1192 = vmatpush1.bf16.msra.mxu1 %v1191_v44  ;;  %1320 = vmatpush1.bf16.msra.mxu0 %v1319_v45  ;;  %v666_v44 = vld [vmem:[#allocation11 + $0x768] sm:$0xff]  ;;  %v664_v45 = vld [vmem:[#allocation11 + $0x758] sm:$0xff]  ;;  %v1024_v37 = vrot.slane %v1668_v29, %v1015_v30 }
 0x241   :  { %1194 = vmatprep.subr.bf16.mxu1 %v1193_v48  ;;  %1322 = vmatprep.subr.bf16.mxu0 %v1321_v49  ;;  %v1339_v48 = vpack.c.bf16 %v659_v42, %v655_v41  ;;  %v661_v49 = vld [vmem:[#allocation11 + $0x740] sm:$0xff]  ;;  %v1213_v51 = vpack.c.bf16 %v666_v44, %v662_v43  ;;  %v1341_v52 = vpack.c.bf16 %v668_v46, %v664_v45 }
 0x242   :  { %v1215_v62 = vpack.c.bf16 %v665_v50, %v661_v49  ;;  %v1032_v41 = vrot.slane %v1012_v34, %v1011_v27  ;;  %v1044_v46 = vrot.slane %v1024_v37, %v1011_v27 }
 0x244   :  { %1196 = vmatpush1.bf16.msra.mxu1 %v1195_v57  ;;  %1324 = vmatpush1.bf16.msra.mxu0 %v1323_v58  ;;  %v674_v57 = vld [vmem:[#allocation11 + $0x7a8] sm:$0xff]  ;;  %v672_v58 = vld [vmem:[#allocation11 + $0x798] sm:$0xff] }
 0x245   :  { %1198 = vmatprep.subr.bf16.mxu1 %v1197_v63  ;;  %1326 = vmatprep.subr.bf16.mxu0 %v1325_v1  ;;  %v1343_v63 = vpack.c.bf16 %v667_v54, %v663_v53  ;;  %v669_v1 = vld [vmem:[#allocation11 + $0x780] sm:$0xff]  ;;  %v1217_v3 = vpack.c.bf16 %v674_v57, %v670_v56  ;;  %v1345_v4 = vpack.c.bf16 %v676_v61, %v672_v58 }
 0x246   :  { %v1219_v11 = vpack.c.bf16 %v673_v2, %v669_v1 }
 0x248   :  { %1200 = vmatpush1.bf16.msra.mxu1 %v1199_v8  ;;  %1328 = vmatpush1.bf16.msra.mxu0 %v1327_v9  ;;  %v682_v8 = vld [vmem:[#allocation11 + $0x7e8] sm:$0xff]  ;;  %v680_v9 = vld [vmem:[#allocation11 + $0x7d8] sm:$0xff] }
 0x249   :  { %1202 = vmatprep.subr.bf16.mxu1 %v1201_v12  ;;  %1330 = vmatprep.subr.bf16.mxu0 %v1329_v13  ;;  %v1347_v12 = vpack.c.bf16 %v675_v6, %v671_v5  ;;  %v677_v13 = vld [vmem:[#allocation11 + $0x7c0] sm:$0xff]  ;;  %v1221_v14 = vpack.c.bf16 %v682_v8, %v678_v7  ;;  %v1349_v15 = vpack.c.bf16 %v684_v10, %v680_v9 }
 0x24c   :  { %1204 = vmatpush1.bf16.msra.mxu1 %v1203_v20  ;;  %1332 = vmatpush1.bf16.msra.mxu0 %v1331_v21  ;;  %v1223_v20 = vpack.c.bf16 %v681_v16, %v677_v13  ;;  %v1351_v21 = vpack.c.bf16 %v683_v18, %v679_v17 }
 0x24d   :  { %1206 = vmatprep.subr.bf16.mxu1 %v1205_v24  ;;  %1334 = vmatprep.subr.bf16.mxu0 %v1333_v25  ;;  %v971_v24 = vsub.s32 2, %v1657_v26  ;;  %v975_v25 = vsub.s32 6, %v1657_v26 }
 0x24f   :  { %v972_v31 = vrot.slane %v1663_v28, %v971_v24  ;;  %v980_v32 = vrot.slane %v1668_v29, %v971_v24  ;;  %v976_v59 = vrot.slane %v1663_v28, %v975_v25  ;;  %v984_v33 = vrot.slane %v1668_v29, %v975_v25 }
 0x250   :  { %1208 = vmatpush1.bf16.msra.mxu1 %v1207_v35  ;;  %1336 = vmatpush1.bf16.msra.mxu0 %v1335_v36  ;;  %v1020_v35 = vrot.slane %v1668_v29, %v1011_v27  ;;  %v1016_v36 = vrot.slane %v1663_v28, %v1015_v30 }
 0x251   :  { %1210 = vmatprep.subr.bf16.mxu1 %v1209_v39  ;;  %1338 = vmatprep.subr.bf16.mxu0 %v1337_v40  ;;  %v992_v38 = vrot.slane %v972_v31, %v971_v24  ;;  %v1000_v39 = vrot.slane %v980_v32, %v971_v24  ;;  %v996_v40 = vrot.slane %v976_v59, %v971_v24 }
 0x252   :  { %v1004_v26 = vrot.slane %v984_v33, %v971_v24  ;;  %v1040_v42 = vrot.slane %v1020_v35, %v1011_v27  ;;  %v1036_v45 = vrot.slane %v1016_v36, %v1011_v27 }
 0x254   :  { %1212 = vmatpush1.bf16.msra.mxu1 %v1211_v47  ;;  %1340 = vmatpush1.bf16.msra.mxu0 %v1339_v48 }
 0x255   :  { %1214 = vmatprep.subr.bf16.mxu1 %v1213_v51  ;;  %1342 = vmatprep.subr.bf16.mxu0 %v1341_v52 }
 0x258   :  { %1216 = vmatpush1.bf16.msra.mxu1 %v1215_v62  ;;  %1344 = vmatpush1.bf16.msra.mxu0 %v1343_v63 }
 0x259   :  { %1218 = vmatprep.subr.bf16.mxu1 %v1217_v3  ;;  %1346 = vmatprep.subr.bf16.mxu0 %v1345_v4 }
 0x25c   :  { %1220 = vmatpush1.bf16.msra.mxu1 %v1219_v11  ;;  %1348 = vmatpush1.bf16.msra.mxu0 %v1347_v12 }
 0x25d   :  { %1222 = vmatprep.subr.bf16.mxu1 %v1221_v14  ;;  %1350 = vmatprep.subr.bf16.mxu0 %v1349_v15 }
 0x260   :  { %1224 = vmatpush1.bf16.msra.mxu1 %v1223_v20  ;;  %1352 = vmatpush1.bf16.msra.mxu0 %v1351_v21 }
 0x263   :  { %821 = vmatmul.mubr.f32.vlgmr.msra.gmra.mrb[2].mxu1 %v427_v23  ;;  %963 = vmatmul.mubr.f32.vlgmr.msra.gmra.mrb[4].mxu0 %v427_v23 }
 0x336   :  { %v822_v43 = vpop.f32.mrb[2].mxu1  ;;  %v964_v44 = vpop.f32.mrb[4].mxu0 }
 0x337   :  { %v1005_v47 = vmul.f32 %v992_v38, %v822_v43  ;;  %v1007_v48 = vmul.f32 %v1000_v39, %v964_v44  ;;  %v824_v49 = vpop.f32.mrb[3].mxu1  ;;  %v966_v50 = vpop.f32.mrb[5].mxu0 }
 0x338   :  { %v1006_v51 = vmul.f32 %v996_v40, %v824_v49  ;;  %v1008_v52 = vmul.f32 %v1004_v26, %v966_v50 }
 0x339   :  { %v1045_v53 = vadd.f32 %v1032_v41, %v1005_v47  ;;  %v1047_v28 = vadd.f32 %v1040_v42, %v1007_v48 }
 0x33a   :  { %v1046_v54 = vadd.f32 %v1036_v45, %v1006_v51  ;;  %v1048_v29 = vadd.f32 %v1044_v46, %v1008_v52 }
 0x33b   :  { %v1049_v56 = vmul.f32 %v1045_v53, %v1681_v55  ;;  %v1051_v57 = vmul.f32 %v1047_v28, %v183_v19 }
 0x33c   :  { %v1050_v58 = vmul.f32 %v1046_v54, %v1685_v60  ;;  %v1052_v61 = vmul.f32 %v1048_v29, %v1687_v0 }
 0x33d   :  { %v1053_v62 = vmax.f32 %v1049_v56, 0.0  ;;  %v1055_v63 = vmax.f32 %v1051_v57, 0.0 }
 0x33e   :  { %v1054_v1 = vmax.f32 %v1050_v58, 0.0  ;;  %v1056_v2 = vmax.f32 %v1052_v61, 0.0 }
 0x33f   :  { %1057 = vst [vmem:[#allocation13] sm:$0xff] %v1053_v62  ;;  %1059 = vst [vmem:[#allocation13 + $0x10] sm:$0xff] %v1055_v63 }
 0x340   :  { %1058 = vst [vmem:[#allocation13 + $0x8] sm:$0xff] %v1054_v1  ;;  %1060 = vst [vmem:[#allocation13 + $0x18] sm:$0xff] %v1056_v2 }
 0x341   :  { %1511 = shalt.err (!%p1508_p10)
}
 0x342   :  { %s1512_s29 = scalar_lea.hbm %s1727_s7, 512 }
 0x343   :  { %p1513_p11 = scmp.ne.s32.totalorder %s1727_s7, %s1512_s29  ;;  %p1516_p12 = scmp.lt.u32.totalorder %s1512_s29, %s1727_s7 }
 0x345   :  { %p1518_p13 = pnand %p1516_p12, %p1513_p11 }
 0x347   :  { %1521 = shalt.err (!%p1518_p13)
}
 0x348   :  { %1070 = dma.vmem_to_hbm [thread:$0]  %s1068_s23, 512, %s1727_s7, [#allocation4]  }
 0x349   :  { %1530 = dma.done.wait [#allocation4], 512  }
 0x34a   :  { %1531 = vsyncadd [#allocation4], 4294966784 }
 0x34b   :  { %1074 = vsyncpa [#allocation3], 1 }
 0x34c   :  { %1075 = vsyncpa [#allocation6], 1 }
 0x34d   :  { %1076 = vsyncpa [#allocation9], 1 }
 0x34e   :  { %1077 = vsyncpa [#allocation12], 1 }
 0x34f   :  { %1078 = vsyncpa [#allocation4], 1 }

</bundles_post_ra>
